<compile_context>
chip_gen: v6e
topology: v6e:2x2x1
jax: 0.10.0
libtpu: 0.0.40
codegen_flags: <defaults>
</compile_context>

<pallas_src>
import functools
import math

import jax
import jax.numpy as jnp
from jax.experimental import pallas as pl
from jax.experimental.pallas import tpu as pltpu

RMS_EPS = 1e-8


def _round_up(x, n):
    return ((x + n - 1) // n) * n


@functools.lru_cache(maxsize=None)
def _tpu_config():
    """(mxu operand dtype, per-core VMEM capacity bytes, default row tile)."""
    mxu_dtype, vmem_cap, row_tile = jnp.bfloat16, 64 << 20, 128
    try:
        dev = jax.devices()[0]
        if dev.platform != "tpu":
            return mxu_dtype, vmem_cap, row_tile
        kind = (getattr(dev, "device_kind", "") or "").lower()
        try:
            vmem_cap = int(pltpu.get_tpu_info().vmem_capacity_bytes)
        except Exception:
            vmem_cap = (128 << 20) if ("v5" in kind or "v6" in kind) else (64 << 20)
        if "v7" in kind or "7x" in kind:
            mxu_dtype, row_tile = jnp.bfloat16, 128     # v7x MXU is bf16/fp8 only
        elif "v5" in kind or "v6" in kind:
            mxu_dtype, row_tile = jnp.int8, 256         # int8 MXU: 2x rate, half bytes
    except Exception:
        pass
    return mxu_dtype, vmem_cap, row_tile


# --------------------------- in-kernel helpers ---------------------------------
def _quantize(v, int_mxu, q_dtype):
    # |v| <= 127 by construction (scale = 127 / max|row|): no clip is needed and the
    # rounded values are exact in both int8 and bf16.
    q = jnp.round(v)
    if int_mxu:
        q = q.astype(jnp.int32)          # f32 -> i32 -> i8 conversion chain
    return q.astype(q_dtype)


def _mxu_dot(a, b, int_mxu):
    acc = jnp.int32 if int_mxu else jnp.float32
    return jnp.dot(a, b, preferred_element_type=acc).astype(jnp.float32)


# --------------------------- kernel A: resident weights -------------------------
def _hgrn_bit_mlp_resident_kernel(h_orig, i_orig, int_mxu, q_dtype,
                                  x_ref, g1_ref, wgg_ref, wgu_ref, g2_ref, wd_ref,
                                  o_ref):
    """Fused BitLinear(gate_proj) -> swiglu -> BitLinear(down_proj) for one row tile,
    with all ternary weights resident in VMEM (fetched once; block index constant)."""
    x = x_ref[...].astype(jnp.float32)

    # BitLinear #1 front-end: RMSNorm over the UN-padded width + per-row fake-quant.
    var1 = jnp.sum(x * x, axis=-1, keepdims=True) * (1.0 / h_orig)
    xn = x * jax.lax.rsqrt(var1 + RMS_EPS) * g1_ref[...]       # weight scale folded in
    amax1 = jnp.maximum(jnp.max(jnp.abs(xn), axis=-1, keepdims=True), 1e-5)
    q1 = _quantize(xn * (127.0 / amax1), int_mxu, q_dtype)
    r1 = amax1 * (1.0 / 127.0)                                  # per-row dequant scale

    gate = _mxu_dot(q1, wgg_ref[...], int_mxu)
    up = _mxu_dot(q1, wgu_ref[...], int_mxu)

    # swiglu. RMSNorm #2 is invariant to a positive per-row scale, so the r1 dequant
    # only needs to appear inside the sigmoid argument (saves two (tm, I) multiplies).
    h = gate * jax.nn.sigmoid(gate * r1) * up

    # BitLinear #2 front-end.
    var2 = jnp.sum(h * h, axis=-1, keepdims=True) * (1.0 / i_orig)
    hn = h * jax.lax.rsqrt(var2 + RMS_EPS) * g2_ref[...]        # weight scale folded in
    amax2 = jnp.maximum(jnp.max(jnp.abs(hn), axis=-1, keepdims=True), 1e-5)
    q2 = _quantize(hn * (127.0 / amax2), int_mxu, q_dtype)
    r2 = amax2 * (1.0 / 127.0)

    z = _mxu_dot(q2, wd_ref[...], int_mxu) * r2
    o_ref[...] = z.astype(o_ref.dtype)


# --------------------------- kernel B: streamed weights -------------------------
def _hgrn_bit_mlp_streamed_kernel(h_orig, i_orig, ti, n_itiles, int_mxu, q_dtype,
                                  x_ref, g1_ref, wgg_ref, wgu_ref, g2_ref, wd_ref,
                                  o_ref,
                                  q1_ref, r1_ref, h_ref, q2_ref, r2_ref, acc_ref):
    """Same math as the resident kernel, but the weights are streamed over grid axis 1
    (2 * n_itiles steps): phase 0 streams (H, ti) gate/up column tiles and fills the
    h scratch; phase 1 streams (ti, H) down_proj K tiles and accumulates the output.
    Used when the resident weights would not fit the per-TensorCore VMEM budget (v7x
    at production H/I)."""
    j = pl.program_id(1)

    # ---- phase 0, first step: BitLinear #1 front-end (RMSNorm + fake-quant) ----
    @pl.when(j == 0)
    def _():
        x = x_ref[...].astype(jnp.float32)
        var1 = jnp.sum(x * x, axis=-1, keepdims=True) * (1.0 / h_orig)
        xn = x * jax.lax.rsqrt(var1 + RMS_EPS) * g1_ref[...]
        amax1 = jnp.maximum(jnp.max(jnp.abs(xn), axis=-1, keepdims=True), 1e-5)
        q1_ref[...] = _quantize(xn * (127.0 / amax1), int_mxu, q_dtype)
        r1_ref[...] = amax1 * (1.0 / 127.0)

    # ---- phase 0: one streamed gate/up weight column tile -> one h column tile ----
    @pl.when(j < n_itiles)
    def _():
        q1 = q1_ref[...]
        gate = _mxu_dot(q1, wgg_ref[...], int_mxu)
        up = _mxu_dot(q1, wgu_ref[...], int_mxu)
        h_ref[j] = gate * jax.nn.sigmoid(gate * r1_ref[...]) * up

    # ---- phase boundary: BitLinear #2 front-end over the full (tm, I) h ----
    @pl.when(j == n_itiles)
    def _():
        h = h_ref[...]                                                    # (J, tm, ti)
        ss = jnp.sum(jnp.sum(h * h, axis=-1, keepdims=True), axis=0, keepdims=True)
        hn = h * jax.lax.rsqrt(ss * (1.0 / i_orig) + RMS_EPS) * g2_ref[...]
        am = jnp.max(jnp.max(jnp.abs(hn), axis=-1, keepdims=True), axis=0, keepdims=True)
        amax2 = jnp.maximum(am, 1e-5)                                     # (1, tm, 1)
        q2_ref[...] = _quantize(hn * (127.0 / amax2), int_mxu, q_dtype)
        r2_ref[...] = amax2[0] * (1.0 / 127.0)                            # (tm, 1)
        acc_ref[...] = jnp.zeros_like(acc_ref)

    # ---- phase 1: one streamed down_proj K tile -> accumulate ----
    @pl.when(j >= n_itiles)
    def _():
        kk = j - n_itiles
        acc_ref[...] += _mxu_dot(q2_ref[kk], wd_ref[...], int_mxu)

    @pl.when(j == 2 * n_itiles - 1)
    def _():
        o_ref[...] = (acc_ref[...] * r2_ref[...]).astype(o_ref.dtype)


# --------------------------- parameter preparation ------------------------------
def _weight_quant_ternary(w):
    """BitNet 1.58b ternary fake-quant: integer ternary values + dequant scale."""
    inv_s = jnp.maximum(jnp.mean(jnp.abs(w)), 1e-5)
    tern = jnp.clip(jnp.round(w / inv_s), -1.0, 1.0)
    return tern, inv_s


def prepare_hgrn_bit_mlp_params(wg, g1, wd, g2, *, mxu_dtype=None):
    """One-time parameter transform, hoisted out of the forward path (per review):
    ternary weight fake-quant, transpose to (K, N), zero-padding of H/I to multiples
    of 128, cast to the MXU operand dtype, and folding of the scalar weight dequant
    scales into the RMSNorm gains (exactly equivalent: the per-row int8 fake-quant is
    invariant to a positive scale on its input, and the per-row dequant scale
    max|xn|/127 absorbs the weight scale)."""
    if mxu_dtype is None:
        mxu_dtype = _tpu_config()[0]
    two_i, h = wg.shape
    inter = two_i // 2
    assert wd.shape == (h, inter)
    hp = _round_up(h, 128)
    ip = _round_up(inter, 128)

    # Quant scales come from the UN-padded weights.
    tern_g, inv_sg = _weight_quant_ternary(wg)
    tern_d, inv_sd = _weight_quant_ternary(wd)

    def pad2(a, rows, cols):
        return jnp.pad(a, ((0, rows - a.shape[0]), (0, cols - a.shape[1])))

    wgg = pad2(tern_g[:inter, :].T, hp, ip).astype(mxu_dtype)   # (Hp, Ip) gate half
    wgu = pad2(tern_g[inter:, :].T, hp, ip).astype(mxu_dtype)   # (Hp, Ip) up half
    wdt = pad2(tern_d.T, ip, hp).astype(mxu_dtype)              # (Ip, Hp)

    g1p = pad2((g1 * inv_sg).reshape(1, h).astype(jnp.float32), 1, hp)
    g2p = pad2((g2 * inv_sd).reshape(1, inter).astype(jnp.float32), 1, ip)

    return {"wgg": wgg, "wgu": wgu, "wdt": wdt, "g1": g1p, "g2": g2p,
            "h": h, "inter": inter, "hp": hp, "ip": ip}


# --------------------------------- forward --------------------------------------
def hgrn_bit_mlp_forward(x, params, *, row_tile=None, stream_weights=None):
    """x: (..., H). params: output of prepare_hgrn_bit_mlp_params."""
    *lead, h = x.shape
    assert h == params["h"]
    m = 1
    for d in lead:
        m *= d
    hp, ip, inter = params["hp"], params["ip"], params["inter"]
    q_dtype = params["wgg"].dtype
    int_mxu = bool(jnp.issubdtype(q_dtype, jnp.integer))

    _, vmem_cap, cfg_row_tile = _tpu_config()
    if row_tile is None:
        row_tile = cfg_row_tile
    row_align = 32 if int_mxu else 8          # int8 native sublane tile is 32
    tm = max(row_align, min(_round_up(row_tile, row_align), _round_up(m, row_align)))
    m_pad = _round_up(m, tm)
    grid_m = m_pad // tm

    x2d = x.reshape(m, h)
    if m_pad != m or hp != h:
        # Padded zero rows provably produce zero outputs; padded H lanes carry zeros
        # through the whole pipeline (sliced off below).
        x2d = jnp.pad(x2d, ((0, m_pad - m), (0, hp - h)))

    wbytes = jnp.dtype(q_dtype).itemsize
    xbytes = jnp.dtype(x.dtype).itemsize
    # Resident-weight VMEM footprint.  The pipeline double-buffers every input block,
    # so the constant-index weights are conservatively counted twice.
    # TODO(synk): mark the constant-index weight specs pipeline_mode=pl.Buffered(1)
    # once single-buffering is verified on the target jax version; that would halve
    # this figure and push the resident/streamed crossover higher.
    resident_bytes = (2 * 3 * hp * ip * wbytes            # wgg + wgu + wdt (x2 buffers)
                      + 2 * 2 * tm * hp * xbytes          # x + out row tiles (x2)
                      + 6 * tm * ip * 4 + 4 * tm * hp * 4)  # live f32 temporaries
    # Per-TensorCore budget: get_tpu_info() reports per-core VMEM, so this is already
    # correct for dual-TC v7x parts when the M axis is sharded across cores.
    vmem_budget = max(32 << 20, int(0.80 * vmem_cap))
    if stream_weights is None:
        stream_weights = resident_bytes > int(0.85 * vmem_budget)

    out_dtype = x.dtype

    if not stream_weights:
        kernel = functools.partial(_hgrn_bit_mlp_resident_kernel,
                                   h, inter, int_mxu, q_dtype)
        vmem_limit = min(vmem_budget,
                         max(32 << 20, int(1.25 * resident_bytes) + (8 << 20)))
        out2d = pl.pallas_call(
            kernel,
            out_shape=jax.ShapeDtypeStruct((m_pad, hp), out_dtype),
            grid_spec=pltpu.PrefetchScalarGridSpec(
                num_scalar_prefetch=0,
                grid=(grid_m,),
                in_specs=[
                    pl.BlockSpec((tm, hp), lambda i: (i, 0)),     # x rows
                    pl.BlockSpec((1, hp), lambda i: (0, 0)),      # rmsnorm1 gain (*1/s_w)
                    pl.BlockSpec((hp, ip), lambda i: (0, 0)),     # Wg^T gate half
                    pl.BlockSpec((hp, ip), lambda i: (0, 0)),     # Wg^T up half
                    pl.BlockSpec((1, ip), lambda i: (0, 0)),      # rmsnorm2 gain (*1/s_w)
                    pl.BlockSpec((ip, hp), lambda i: (0, 0)),     # Wd^T
                ],
                out_specs=pl.BlockSpec((tm, hp), lambda i: (i, 0)),
            ),
            compiler_params=pltpu.CompilerParams(
                dimension_semantics=("parallel",),
                vmem_limit_bytes=vmem_limit,
            ),
        )(x2d, params["g1"], params["wgg"], params["wgu"], params["g2"], params["wdt"])
    else:
        # Weight-streaming path (v7x at production H/I).  ~512-wide column tiles keep
        # VMEM small while 3.2 TB/s HBM easily feeds the MXU.
        ti = math.gcd(ip, 512)
        n_itiles = ip // ti
        g2_3d = params["g2"].reshape(n_itiles, 1, ti)
        kernel = functools.partial(_hgrn_bit_mlp_streamed_kernel,
                                   h, inter, ti, n_itiles, int_mxu, q_dtype)
        streamed_bytes = (2 * 3 * hp * ti * wbytes                 # streamed weight tiles
                          + n_itiles * tm * ti * (4 + wbytes)      # h + q2 scratch
                          + tm * hp * (wbytes + 4)                 # q1 + acc scratch
                          + 2 * 2 * tm * hp * xbytes               # x + out row tiles
                          + 6 * tm * ti * 4)                       # live f32 temporaries
        vmem_limit = min(vmem_budget,
                         max(32 << 20, int(1.25 * streamed_bytes) + (8 << 20)))
        out2d = pl.pallas_call(
            kernel,
            out_shape=jax.ShapeDtypeStruct((m_pad, hp), out_dtype),
            grid_spec=pltpu.PrefetchScalarGridSpec(
                num_scalar_prefetch=0,
                grid=(grid_m, 2 * n_itiles),
                in_specs=[
                    pl.BlockSpec((tm, hp), lambda i, j: (i, 0)),            # x rows
                    pl.BlockSpec((1, hp), lambda i, j: (0, 0)),             # rmsnorm1 gain
                    pl.BlockSpec((hp, ti),
                                 lambda i, j: (0, jnp.minimum(j, n_itiles - 1))),
                    pl.BlockSpec((hp, ti),
                                 lambda i, j: (0, jnp.minimum(j, n_itiles - 1))),
                    pl.BlockSpec((n_itiles, 1, ti), lambda i, j: (0, 0, 0)),  # rmsnorm2 gain
                    pl.BlockSpec((ti, hp),
                                 lambda i, j: (jnp.maximum(j - n_itiles, 0), 0)),
                ],
                out_specs=pl.BlockSpec((tm, hp), lambda i, j: (i, 0)),
                scratch_shapes=[
                    pltpu.VMEM((tm, hp), q_dtype),                   # q1
                    pltpu.VMEM((tm, 1), jnp.float32),                # r1
                    pltpu.VMEM((n_itiles, tm, ti), jnp.float32),     # h
                    pltpu.VMEM((n_itiles, tm, ti), q_dtype),         # q2
                    pltpu.VMEM((tm, 1), jnp.float32),                # r2
                    pltpu.VMEM((tm, hp), jnp.float32),               # output accumulator
                ],
            ),
            compiler_params=pltpu.CompilerParams(
                dimension_semantics=("parallel", "arbitrary"),
                vmem_limit_bytes=vmem_limit,
            ),
        )(x2d, params["g1"], params["wgg"], params["wgu"], g2_3d, params["wdt"])

    # TODO(synk): for latency-bound decode (grid_m == 1) the weight DMA is fully
    # exposed; start it in a prior pallas_call (cross-call semaphore future) when this
    # MLP sits inside a decode loop.
    out2d = out2d[:m, :h]
    return out2d.reshape(*lead, h)


def hgrn_bit_mlp(x, wg, g1, wd, g2, **kwargs):
    """One-shot convenience wrapper; in a real model call prepare_* once and reuse."""
    return hgrn_bit_mlp_forward(x, prepare_hgrn_bit_mlp_params(wg, g1, wd, g2), **kwargs)


# --------------------------- pure-JAX reference ---------------------------------
def _ref_weight_quant(w):
    s = 1.0 / jnp.maximum(jnp.mean(jnp.abs(w)), 1e-5)
    return jnp.clip(jnp.round(w * s), -1.0, 1.0) / s


def _ref_bitlinear(x, w, g):
    var = jnp.mean(x * x, axis=-1, keepdims=True)
    xn = x * jax.lax.rsqrt(var + RMS_EPS) * g
    s = 127.0 / jnp.maximum(jnp.max(jnp.abs(xn), axis=-1, keepdims=True), 1e-5)
    xq = jnp.clip(jnp.round(xn * s), -128.0, 127.0) / s
    return xq @ _ref_weight_quant(w).T


def ref_hgrn_bit_mlp(x, wg, g1, wd, g2):
    y = _ref_bitlinear(x, wg, g1)
    inter = y.shape[-1] // 2
    gate, up = y[..., :inter], y[..., inter:]
    return _ref_bitlinear(gate * jax.nn.sigmoid(gate) * up, wd, g2)


# ----------------------------------- main ----------------------------------------
if __name__ == "__main__":
    # Module config (matches HGRNBitMLP.__init__ defaults):
    hidden_size = 32
    hidden_ratio = 4
    intermediate_size = int(hidden_size * hidden_ratio * 2 / 3)
    intermediate_size = 256 * ((intermediate_size + 256 - 1) // 256)   # -> 256

    batch, seq = 2, 8

    key = jax.random.PRNGKey(0)
    kx, kg, kd = jax.random.split(key, 3)
    x = jax.random.normal(kx, (batch, seq, hidden_size), dtype=jnp.float32)
    # gate_proj.weight: (2*intermediate, hidden); down_proj.weight: (hidden, intermediate)
    wg = jax.random.normal(kg, (2 * intermediate_size, hidden_size), dtype=jnp.float32) * 0.02
    wd = jax.random.normal(kd, (hidden_size, intermediate_size), dtype=jnp.float32) * 0.02
    # RMSNorm weights inside each BitLinear (init = ones)
    g1 = jnp.ones((hidden_size,), dtype=jnp.float32)
    g2 = jnp.ones((intermediate_size,), dtype=jnp.float32)

    ref = ref_hgrn_bit_mlp(x, wg, g1, wd, g2)

    # One-time parameter transform (hoisted out of the forward path).
    params = prepare_hgrn_bit_mlp_params(wg, g1, wd, g2)

    # Default (generation-tuned) path: resident weights, int8 MXU on v5e/v6e, bf16 on v7x.
    out = jax.block_until_ready(hgrn_bit_mlp_forward(x, params))
    assert out.shape == (batch, seq, hidden_size)
    assert jnp.allclose(out, ref, rtol=2e-2, atol=2e-2), "kernel mismatch (default path)"

    # Also exercise the weight-streaming path (auto-selected on v7x at production H/I).
    out_s = jax.block_until_ready(hgrn_bit_mlp_forward(x, params, stream_weights=True))
    assert jnp.allclose(out_s, ref, rtol=2e-2, atol=2e-2), "kernel mismatch (streamed path)"

    # On int8-MXU chips also validate the generation-independent bf16 path.
    if jnp.issubdtype(params["wgg"].dtype, jnp.integer):
        params_bf16 = prepare_hgrn_bit_mlp_params(wg, g1, wd, g2, mxu_dtype=jnp.bfloat16)
        out_bf = jax.block_until_ready(hgrn_bit_mlp_forward(x, params_bf16))
        assert jnp.allclose(out_bf, ref, rtol=2e-2, atol=2e-2), "kernel mismatch (bf16 path)"

    print("KERNEL_OK")
</pallas_src>

<mosaic_0001>
module attributes {stable_mosaic.version = 11 : i64} {
  func.func @_hgrn_bit_mlp_resident_kernel(%arg0: i32, %arg1: memref<16x128xf32, #tpu.memory_space<vmem>>, %arg2: memref<1x128xf32, #tpu.memory_space<vmem>>, %arg3: memref<128x256xbf16, #tpu.memory_space<vmem>>, %arg4: memref<128x256xbf16, #tpu.memory_space<vmem>>, %arg5: memref<1x256xf32, #tpu.memory_space<vmem>>, %arg6: memref<256x128xbf16, #tpu.memory_space<vmem>>, %arg7: memref<16x128xf32, #tpu.memory_space<vmem>>) attributes {dimension_semantics = [#tpu.dimension_semantics<parallel>], iteration_bounds = array<i64: 1>, scalar_prefetch = 0 : i64, scratch_operands = 0 : i64, tpu.core_type = #tpu.core_type<tc>, window_params = [{transform_indices = @transform_0, window_bounds = array<i64: 16, 128>}, {pipeline_mode = #tpu.pipeline_mode<synchronous>, transform_indices = @transform_1, window_bounds = array<i64: 1, 128>}, {pipeline_mode = #tpu.pipeline_mode<synchronous>, transform_indices = @transform_2, window_bounds = array<i64: 128, 256>}, {pipeline_mode = #tpu.pipeline_mode<synchronous>, transform_indices = @transform_3, window_bounds = array<i64: 128, 256>}, {pipeline_mode = #tpu.pipeline_mode<synchronous>, transform_indices = @transform_4, window_bounds = array<i64: 1, 256>}, {pipeline_mode = #tpu.pipeline_mode<synchronous>, transform_indices = @transform_5, window_bounds = array<i64: 256, 128>}, {transform_indices = @transform_6, window_bounds = array<i64: 16, 128>}]} {
    %c0 = arith.constant 0 : index
    %c0_0 = arith.constant 0 : index
    %0 = vector.load %arg1[%c0, %c0_0] : memref<16x128xf32, #tpu.memory_space<vmem>>, vector<16x128xf32>
    %1 = arith.mulf %0, %0 : vector<16x128xf32>
    %cst = arith.constant dense<0.000000e+00> : vector<16xf32>
    %2 = vector.multi_reduction <add>, %1, %cst [1] : vector<16x128xf32> to vector<16xf32>
    %3 = vector.shape_cast %2 : vector<16xf32> to vector<16x1xf32>
    %cst_1 = arith.constant 3.125000e-02 : f32
    %4 = vector.broadcast %cst_1 : f32 to vector<16x1xf32>
    %5 = arith.mulf %3, %4 : vector<16x1xf32>
    %cst_2 = arith.constant 9.99999993E-9 : f32
    %6 = vector.broadcast %cst_2 : f32 to vector<16x1xf32>
    %7 = arith.addf %5, %6 : vector<16x1xf32>
    %8 = math.rsqrt %7 : vector<16x1xf32>
    %9 = vector.broadcast %8 : vector<16x1xf32> to vector<16x128xf32>
    %10 = arith.mulf %0, %9 : vector<16x128xf32>
    %c0_3 = arith.constant 0 : index
    %c0_4 = arith.constant 0 : index
    %11 = vector.load %arg2[%c0_3, %c0_4] : memref<1x128xf32, #tpu.memory_space<vmem>>, vector<1x128xf32>
    %12 = vector.broadcast %11 : vector<1x128xf32> to vector<16x128xf32>
    %13 = arith.mulf %10, %12 : vector<16x128xf32>
    %14 = math.absf %13 : vector<16x128xf32>
    %cst_5 = arith.constant dense<0xFF800000> : vector<16xf32>
    %15 = vector.multi_reduction <maximumf>, %14, %cst_5 [1] : vector<16x128xf32> to vector<16xf32>
    %16 = vector.shape_cast %15 : vector<16xf32> to vector<16x1xf32>
    %cst_6 = arith.constant 9.99999974E-6 : f32
    %17 = vector.broadcast %cst_6 : f32 to vector<16x1xf32>
    %18 = arith.maximumf %16, %17 : vector<16x1xf32>
    %cst_7 = arith.constant 1.270000e+02 : f32
    %19 = vector.broadcast %cst_7 : f32 to vector<16x1xf32>
    %20 = arith.divf %19, %18 : vector<16x1xf32>
    %21 = vector.broadcast %20 : vector<16x1xf32> to vector<16x128xf32>
    %22 = arith.mulf %13, %21 : vector<16x128xf32>
    %23 = math.roundeven %22 : vector<16x128xf32>
    %24 = arith.truncf %23 : vector<16x128xf32> to vector<16x128xbf16>
    %cst_8 = arith.constant 0.00787401571 : f32
    %25 = vector.broadcast %cst_8 : f32 to vector<16x1xf32>
    %26 = arith.mulf %18, %25 : vector<16x1xf32>
    %c0_9 = arith.constant 0 : index
    %c0_10 = arith.constant 0 : index
    %27 = vector.load %arg3[%c0_9, %c0_10] : memref<128x256xbf16, #tpu.memory_space<vmem>>, vector<128x256xbf16>
    %cst_11 = arith.constant dense<0.000000e+00> : vector<16x256xf32>
    %28 = tpu.matmul %24, %27, %cst_11 {dimension_numbers = #tpu.dot_dimension_numbers<[1], [0], [0], [1], [0, 0, 1, 1], [], []>} : vector<16x128xbf16>, vector<128x256xbf16>, vector<16x256xf32> -> vector<16x256xf32>
    %c0_12 = arith.constant 0 : index
    %c0_13 = arith.constant 0 : index
    %29 = vector.load %arg4[%c0_12, %c0_13] : memref<128x256xbf16, #tpu.memory_space<vmem>>, vector<128x256xbf16>
    %cst_14 = arith.constant dense<0.000000e+00> : vector<16x256xf32>
    %30 = tpu.matmul %24, %29, %cst_14 {dimension_numbers = #tpu.dot_dimension_numbers<[1], [0], [0], [1], [0, 0, 1, 1], [], []>} : vector<16x128xbf16>, vector<128x256xbf16>, vector<16x256xf32> -> vector<16x256xf32>
    %31 = vector.broadcast %26 : vector<16x1xf32> to vector<16x256xf32>
    %32 = arith.mulf %28, %31 : vector<16x256xf32>
    %33 = arith.negf %32 : vector<16x256xf32>
    %34 = math.exp %33 : vector<16x256xf32>
    %cst_15 = arith.constant 1.000000e+00 : f32
    %35 = vector.broadcast %cst_15 : f32 to vector<16x256xf32>
    %36 = arith.addf %35, %34 : vector<16x256xf32>
    %37 = arith.divf %35, %36 : vector<16x256xf32>
    %38 = arith.mulf %28, %37 : vector<16x256xf32>
    %39 = arith.mulf %38, %30 : vector<16x256xf32>
    %40 = arith.mulf %39, %39 : vector<16x256xf32>
    %cst_16 = arith.constant dense<0.000000e+00> : vector<16xf32>
    %41 = vector.multi_reduction <add>, %40, %cst_16 [1] : vector<16x256xf32> to vector<16xf32>
    %42 = vector.shape_cast %41 : vector<16xf32> to vector<16x1xf32>
    %cst_17 = arith.constant 3.906250e-03 : f32
    %43 = vector.broadcast %cst_17 : f32 to vector<16x1xf32>
    %44 = arith.mulf %42, %43 : vector<16x1xf32>
    %cst_18 = arith.constant 9.99999993E-9 : f32
    %45 = vector.broadcast %cst_18 : f32 to vector<16x1xf32>
    %46 = arith.addf %44, %45 : vector<16x1xf32>
    %47 = math.rsqrt %46 : vector<16x1xf32>
    %48 = vector.broadcast %47 : vector<16x1xf32> to vector<16x256xf32>
    %49 = arith.mulf %39, %48 : vector<16x256xf32>
    %c0_19 = arith.constant 0 : index
    %c0_20 = arith.constant 0 : index
    %50 = vector.load %arg5[%c0_19, %c0_20] : memref<1x256xf32, #tpu.memory_space<vmem>>, vector<1x256xf32>
    %51 = vector.broadcast %50 : vector<1x256xf32> to vector<16x256xf32>
    %52 = arith.mulf %49, %51 : vector<16x256xf32>
    %53 = math.absf %52 : vector<16x256xf32>
    %cst_21 = arith.constant dense<0xFF800000> : vector<16xf32>
    %54 = vector.multi_reduction <maximumf>, %53, %cst_21 [1] : vector<16x256xf32> to vector<16xf32>
    %55 = vector.shape_cast %54 : vector<16xf32> to vector<16x1xf32>
    %cst_22 = arith.constant 9.99999974E-6 : f32
    %56 = vector.broadcast %cst_22 : f32 to vector<16x1xf32>
    %57 = arith.maximumf %55, %56 : vector<16x1xf32>
    %cst_23 = arith.constant 1.270000e+02 : f32
    %58 = vector.broadcast %cst_23 : f32 to vector<16x1xf32>
    %59 = arith.divf %58, %57 : vector<16x1xf32>
    %60 = vector.broadcast %59 : vector<16x1xf32> to vector<16x256xf32>
    %61 = arith.mulf %52, %60 : vector<16x256xf32>
    %62 = math.roundeven %61 : vector<16x256xf32>
    %63 = arith.truncf %62 : vector<16x256xf32> to vector<16x256xbf16>
    %cst_24 = arith.constant 0.00787401571 : f32
    %64 = vector.broadcast %cst_24 : f32 to vector<16x1xf32>
    %65 = arith.mulf %57, %64 : vector<16x1xf32>
    %c0_25 = arith.constant 0 : index
    %c0_26 = arith.constant 0 : index
    %66 = vector.load %arg6[%c0_25, %c0_26] : memref<256x128xbf16, #tpu.memory_space<vmem>>, vector<256x128xbf16>
    %cst_27 = arith.constant dense<0.000000e+00> : vector<16x128xf32>
    %67 = tpu.matmul %63, %66, %cst_27 {dimension_numbers = #tpu.dot_dimension_numbers<[1], [0], [0], [1], [0, 0, 1, 1], [], []>} : vector<16x256xbf16>, vector<256x128xbf16>, vector<16x128xf32> -> vector<16x128xf32>
    %68 = vector.broadcast %65 : vector<16x1xf32> to vector<16x128xf32>
    %69 = arith.mulf %67, %68 : vector<16x128xf32>
    %c0_28 = arith.constant 0 : index
    %c0_29 = arith.constant 0 : index
    %70 = vector.load %arg7[%c0_28, %c0_29] : memref<16x128xf32, #tpu.memory_space<vmem>>, vector<16x128xf32>
    tpu.vector_store %arg7[%c0_28, %c0_29], %69 {strides = array<i32>} : memref<16x128xf32, #tpu.memory_space<vmem>>, vector<16x128xf32>,
    return
  }
  func.func @transform_0(%arg0: i32) -> (i32, i32) {
    %c0_i32 = arith.constant 0 : i32
    %c0_i32_0 = arith.constant 0 : i32
    return %arg0, %c0_i32 : i32, i32
  }
  func.func @transform_1(%arg0: i32) -> (i32, i32) {
    %c0_i32 = arith.constant 0 : i32
    %c0_i32_0 = arith.constant 0 : i32
    %c0_i32_1 = arith.constant 0 : i32
    return %c0_i32, %c0_i32_0 : i32, i32
  }
  func.func @transform_2(%arg0: i32) -> (i32, i32) {
    %c0_i32 = arith.constant 0 : i32
    %c0_i32_0 = arith.constant 0 : i32
    %c0_i32_1 = arith.constant 0 : i32
    return %c0_i32, %c0_i32_0 : i32, i32
  }
  func.func @transform_3(%arg0: i32) -> (i32, i32) {
    %c0_i32 = arith.constant 0 : i32
    %c0_i32_0 = arith.constant 0 : i32
    %c0_i32_1 = arith.constant 0 : i32
    return %c0_i32, %c0_i32_0 : i32, i32
  }
  func.func @transform_4(%arg0: i32) -> (i32, i32) {
    %c0_i32 = arith.constant 0 : i32
    %c0_i32_0 = arith.constant 0 : i32
    %c0_i32_1 = arith.constant 0 : i32
    return %c0_i32, %c0_i32_0 : i32, i32
  }
  func.func @transform_5(%arg0: i32) -> (i32, i32) {
    %c0_i32 = arith.constant 0 : i32
    %c0_i32_0 = arith.constant 0 : i32
    %c0_i32_1 = arith.constant 0 : i32
    return %c0_i32, %c0_i32_0 : i32, i32
  }
  func.func @transform_6(%arg0: i32) -> (i32, i32) {
    %c0_i32 = arith.constant 0 : i32
    %c0_i32_0 = arith.constant 0 : i32
    return %arg0, %c0_i32 : i32, i32
  }
}

</mosaic_0001>

<bundles_post_ra>
// kernel: tpu_custom_call.1
= control target key start
LH: loop header
LB: loop body
LE: loop exit
PB: predicated region body
PF: predicated region fallthrough
CT: control target
= control target key end

     0   :  { %11 = vsyncpa [#allocation3], 0  ;;  %s1117_s0 = inlined_call_operand.hbm [shape: f32[16,128], index: 0, kind: input, shape index: {}]   ;;  %s1118_s1 = inlined_call_operand.vmem [shape: f32[1,128], index: 1, kind: input, shape index: {}]   ;;  %s1119_s2 = inlined_call_operand.hbm [shape: bf16[128,256], index: 2, kind: input, shape index: {}]   ;;  %s1120_s3 = inlined_call_operand.hbm [shape: bf16[128,256], index: 3, kind: input, shape index: {}]   ;;  %s1121_s4 = inlined_call_operand.vmem [shape: f32[1,256], index: 4, kind: input, shape index: {}]   ;;  %s1122_s5 = inlined_call_operand.hbm [shape: bf16[256,128], index: 5, kind: input, shape index: {}]   ;;  %s1123_s6 = inlined_call_operand.hbm [shape: f32[16,128], index: 6, kind: output, shape index: {}]  }
   0x1   :  { %12 = vsyncpa [#allocation6], 0 }
   0x2   :  { %13 = vsyncpa [#allocation9], 0 }
   0x3   :  { %14 = vsyncpa [#allocation4], 0  ;;  %s1031_s21 = smov [#allocation5]   ;;  %s1032_s23 = smov [#allocation2]  }
   0x4   :  { %s34_s22 = sshll.u32 %s1031_s21, 4  ;;  %s20_s24 = sshll.u32 %s1032_s23, 4  ;;  %s35_s22 = int_to_ptr.vmem [resolvable:$true] %s34_s22  ;;  %s21_s24 = int_to_ptr.vmem [resolvable:$true] %s20_s24 }
   0x5   :  { %s931_s25 = scalar_lea.vmem %s35_s22, 2048  ;;  %p936_p1 = scmp.lt.s32.totalorder %s35_s22, %s35_s22 }
   0x6   :  { %p932_p0 = scmp.ne.s32.totalorder %s35_s22, %s931_s25  ;;  %p937_p2 = scmp.lt.s32.totalorder %s931_s25, %s931_s25 }
   0x8   :  { %p938_p3 = por %p937_p2, %p936_p1 }
   0xa   :  { %p939_p4 = pnand %p938_p3, %p932_p0 }
   0xc   :  { %942 = shalt.err (!%p939_p4)
}
   0xd   :  { %s1033_s26 = smov 128   ;;  %s1034_s27 = smov 8  }
   0xe   :  { %40 = dma.hbm_to_vmem [thread:$0]  %s1119_s2, 2048, %s35_s22, [#allocation6], %s1033_s26, %s1033_s26, %s1034_s27  }
   0xf   :  { %s951_s30 = scalar_lea.vmem %s21_s24, 256  ;;  %p956_p6 = scmp.lt.s32.totalorder %s21_s24, %s21_s24 }
  0x10   :  { %p952_p5 = scmp.ne.s32.totalorder %s21_s24, %s951_s30  ;;  %p957_p7 = scmp.lt.s32.totalorder %s951_s30, %s951_s30 }
  0x12   :  { %p958_p8 = por %p957_p7, %p956_p6 }
  0x14   :  { %p959_p9 = pnand %p958_p8, %p952_p5 }
  0x16   :  { %962 = shalt.err (!%p959_p9)
}
  0x17   :  { %26 = dma.hbm_to_vmem [thread:$0]  %s1117_s0, 256, %s21_s24, [#allocation3], %s1033_s26, %s1033_s26, %s1034_s27  }
  0x18   :  { %s1035_s9 = smov [#allocation7]   ;;  %s1036_s11 = smov [#allocation8]  }
  0x19   :  { %s46_s10 = sshll.u32 %s1035_s9, 4  ;;  %s60_s12 = sshll.u32 %s1036_s11, 4  ;;  %s47_s10 = int_to_ptr.vmem [resolvable:$true] %s46_s10  ;;  %s61_s12 = int_to_ptr.vmem [resolvable:$true] %s60_s12 }
  0x1a   :  { %s971_s2 = scalar_lea.vmem %s47_s10, 2048  ;;  %p976_p11 = scmp.lt.s32.totalorder %s47_s10, %s47_s10 }
  0x1b   :  { %p972_p10 = scmp.ne.s32.totalorder %s47_s10, %s971_s2  ;;  %p977_p12 = scmp.lt.s32.totalorder %s971_s2, %s971_s2 }
  0x1d   :  { %p978_p13 = por %p977_p12, %p976_p11 }
  0x1f   :  { %p979_p0 = pnand %p978_p13, %p972_p10 }
  0x21   :  { %982 = shalt.err (!%p979_p0)
}
  0x22   :  { %52 = dma.hbm_to_vmem [thread:$0]  %s1120_s3, 2048, %s47_s10, [#allocation6], %s1033_s26, %s1033_s26, %s1034_s27  }
  0x23   :  { %s991_s0 = scalar_lea.vmem %s61_s12, 2048  ;;  %p996_p2 = scmp.lt.s32.totalorder %s61_s12, %s61_s12 }
  0x24   :  { %p992_p1 = scmp.ne.s32.totalorder %s61_s12, %s991_s0  ;;  %p997_p3 = scmp.lt.s32.totalorder %s991_s0, %s991_s0 }
  0x26   :  { %p998_p4 = por %p997_p3, %p996_p2 }
  0x28   :  { %p999_p5 = pnand %p998_p4, %p992_p1 }
  0x2a   :  { %1002 = shalt.err (!%p999_p5)
}
  0x2b   :  { %s1037_s15 = smov 64   ;;  %s1038_s16 = smov 4  }
  0x2c   :  { %66 = dma.hbm_to_vmem [thread:$0]  %s1122_s5, 2048, %s61_s12, [#allocation9], %s1037_s15, %s1037_s15, %s1038_s16  }
  0x2d   :  { %1023 = dma.done.wait [#allocation3], 256  }
  0x2e   :  { %1024 = vsyncadd [#allocation3], 4294967040 }
  0x2f   :  { %1025 = dma.done.wait [#allocation6], 4096  }
  0x30   :  { %1026 = vsyncadd [#allocation6], 4294963200 }
  0x31   :  { %1027 = dma.done.wait [#allocation9], 2048  }
  0x32   :  { %1028 = vsyncadd [#allocation9], 4294965248  ;;  %v80_v0 = vld [vmem:[#allocation2] sm:$0xff]  ;;  %v81_v1 = vld [vmem:[#allocation2 + $0x8] sm:$0xff]  ;;  %v1039_v49 = vmov 0  }
  0x33   :  { %v82_v2 = vmul.f32 %v80_v0, %v80_v0  ;;  %v83_v3 = vmul.f32 %v81_v1, %v81_v1  ;;  %v694_v11 = vld [vmem:[%s1118_s1] ss:$0 sm:$0xff]  ;;  %v827_v19 = vld [vmem:[#allocation5 + $0x74] ss:$8 sps:$4 sm:$0xff]   ;;  %v833_v23 = vld [vmem:[#allocation5 + $0x64] ss:$8 sps:$4 sm:$0xff]   ;;  %252 = vmatprep.mubr.bf16.mxu0 %v1039_v49  ;;  %391 = vmatprep.mubr.bf16.mxu1 %v1039_v49 }
  0x34   :  { %v829_v20 = vld [vmem:[#allocation7 + $0x74] ss:$8 sps:$4 sm:$0xff]   ;;  %v831_v21 = vld [vmem:[#allocation5 + $0x70] ss:$8 sps:$4 sm:$0xff]   ;;  %220 = vmatprep.subr.bf16.mxu0 %v827_v19  ;;  %v835_v24 = vld [vmem:[#allocation7 + $0x64] ss:$8 sps:$4 sm:$0xff]  }
  0x35   :  { %84 = vadd.xlane.f32.xlu0 %v82_v2  ;;  %v832_v22 = vld [vmem:[#allocation7 + $0x70] ss:$8 sps:$4 sm:$0xff]   ;;  %359 = vmatprep.subr.bf16.mxu1 %v829_v20  ;;  %v837_v25 = vld [vmem:[#allocation5 + $0x60] ss:$8 sps:$4 sm:$0xff]   ;;  %v839_v27 = vld [vmem:[#allocation5 + $0x54] ss:$8 sps:$4 sm:$0xff]  }
  0x36   :  { %221 = vmatpush1.bf16.msra.mxu0 %v831_v21  ;;  %360 = vmatpush1.bf16.msra.mxu1 %v832_v22  ;;  %v838_v26 = vld [vmem:[#allocation7 + $0x60] ss:$8 sps:$4 sm:$0xff]   ;;  %v841_v28 = vld [vmem:[#allocation7 + $0x54] ss:$8 sps:$4 sm:$0xff]   ;;  %v843_v29 = vld [vmem:[#allocation5 + $0x50] ss:$8 sps:$4 sm:$0xff]  }
  0x37   :  { %222 = vmatprep.subr.bf16.mxu0 %v833_v23  ;;  %361 = vmatprep.subr.bf16.mxu1 %v835_v24  ;;  %v844_v30 = vld [vmem:[#allocation7 + $0x50] ss:$8 sps:$4 sm:$0xff]   ;;  %v845_v31 = vld [vmem:[#allocation5 + $0x44] ss:$8 sps:$4 sm:$0xff]   ;;  %v849_v33 = vld [vmem:[#allocation5 + $0x40] ss:$8 sps:$4 sm:$0xff]  }
  0x38   :  { %v847_v32 = vld [vmem:[#allocation7 + $0x44] ss:$8 sps:$4 sm:$0xff]   ;;  %v850_v34 = vld [vmem:[#allocation7 + $0x40] ss:$8 sps:$4 sm:$0xff]   ;;  %v851_v35 = vld [vmem:[#allocation5 + $0x34] ss:$8 sps:$4 sm:$0xff]  }
  0x39   :  { %86 = vadd.xlane.f32.xlu0 %v83_v3  ;;  %v853_v36 = vld [vmem:[#allocation7 + $0x34] ss:$8 sps:$4 sm:$0xff]   ;;  %v855_v37 = vld [vmem:[#allocation5 + $0x30] ss:$8 sps:$4 sm:$0xff]   ;;  %v857_v39 = vld [vmem:[#allocation5 + $0x24] ss:$8 sps:$4 sm:$0xff]  }
  0x3a   :  { %223 = vmatpush1.bf16.msra.mxu0 %v837_v25  ;;  %362 = vmatpush1.bf16.msra.mxu1 %v838_v26  ;;  %v856_v38 = vld [vmem:[#allocation7 + $0x30] ss:$8 sps:$4 sm:$0xff]   ;;  %v859_v40 = vld [vmem:[#allocation7 + $0x24] ss:$8 sps:$4 sm:$0xff]   ;;  %v861_v41 = vld [vmem:[#allocation5 + $0x20] ss:$8 sps:$4 sm:$0xff]  }
  0x3b   :  { %224 = vmatprep.subr.bf16.mxu0 %v839_v27  ;;  %363 = vmatprep.subr.bf16.mxu1 %v841_v28  ;;  %v862_v42 = vld [vmem:[#allocation7 + $0x20] ss:$8 sps:$4 sm:$0xff]   ;;  %v863_v43 = vld [vmem:[#allocation5 + $0x14] ss:$8 sps:$4 sm:$0xff]   ;;  %v867_v45 = vld [vmem:[#allocation5 + $0x10] ss:$8 sps:$4 sm:$0xff]  }
  0x3c   :  { %v865_v44 = vld [vmem:[#allocation7 + $0x14] ss:$8 sps:$4 sm:$0xff]   ;;  %v868_v46 = vld [vmem:[#allocation7 + $0x10] ss:$8 sps:$4 sm:$0xff]   ;;  %v869_v47 = vld [vmem:[#allocation5 + $0x4] ss:$8 sps:$4 sm:$0xff]  }
  0x3d   :  { %v871_v48 = vld [vmem:[#allocation7 + $0x4] ss:$8 sps:$4 sm:$0xff]   ;;  %v873_v50 = vld [vmem:[#allocation5] ss:$8 sps:$4 sm:$0xff]  }
  0x3e   :  { %225 = vmatpush1.bf16.msra.mxu0 %v843_v29  ;;  %364 = vmatpush1.bf16.msra.mxu1 %v844_v30  ;;  %v874_v51 = vld [vmem:[#allocation7] ss:$8 sps:$4 sm:$0xff]  }
  0x3f   :  { %226 = vmatprep.subr.bf16.mxu0 %v845_v31  ;;  %365 = vmatprep.subr.bf16.mxu1 %v847_v32 }
  0x42   :  { %227 = vmatpush1.bf16.msra.mxu0 %v849_v33  ;;  %366 = vmatpush1.bf16.msra.mxu1 %v850_v34 }
  0x43   :  { %228 = vmatprep.subr.bf16.mxu0 %v851_v35  ;;  %367 = vmatprep.subr.bf16.mxu1 %v853_v36 }
  0x46   :  { %229 = vmatpush1.bf16.msra.mxu0 %v855_v37  ;;  %368 = vmatpush1.bf16.msra.mxu1 %v856_v38 }
  0x47   :  { %230 = vmatprep.subr.bf16.mxu0 %v857_v39  ;;  %369 = vmatprep.subr.bf16.mxu1 %v859_v40 }
  0x4a   :  { %231 = vmatpush1.bf16.msra.mxu0 %v861_v41  ;;  %370 = vmatpush1.bf16.msra.mxu1 %v862_v42 }
  0x4b   :  { %232 = vmatprep.subr.bf16.mxu0 %v863_v43  ;;  %371 = vmatprep.subr.bf16.mxu1 %v865_v44 }
  0x4e   :  { %233 = vmatpush1.bf16.msra.mxu0 %v867_v45  ;;  %372 = vmatpush1.bf16.msra.mxu1 %v868_v46 }
  0x4f   :  { %234 = vmatprep.subr.bf16.mxu0 %v869_v47  ;;  %373 = vmatprep.subr.bf16.mxu1 %v871_v48 }
  0x52   :  { %235 = vmatpush1.bf16.msra.mxu0 %v873_v50  ;;  %374 = vmatpush1.bf16.msra.mxu1 %v874_v51 }
  0xbe   :  { %v85_v4 = vpop.xlane.xlu0 %84 }
  0xbf   :  { %v88_v5 = vmul.f32 0.03125, %v85_v4 }
  0xc1   :  { %v90_v6 = vadd.f32 1e-08, %v88_v5 }
  0xc2   :  { %v87_v7 = vpop.xlane.xlu0 %86 }
  0xc3   :  { %891 = vrsqrt.f32 %v90_v6  ;;  %v89_v8 = vmul.f32 0.03125, %v87_v7 }
  0xc5   :  { %v91_v9 = vadd.f32 1e-08, %v89_v8 }
  0xc7   :  { %893 = vrsqrt.f32 %v91_v9 }
  0xd0   :  { %v892_v10 = vpop.eup %891 }
  0xd1   :  { %v94_v12 = vmul.f32 %v892_v10, %v80_v0 }
  0xd3   :  { %v1100_v13 = vmul.f32 %v694_v11, %v94_v12 }
  0xd4   :  { %v894_v14 = vpop.eup %893 }
  0xd5   :  { %v105_v15 = vand.u32 2147483647, %v1100_v13  ;;  %v95_v16 = vmul.f32 %v894_v14, %v81_v1 }
  0xd7   :  { %107 = vmax.xlane.f32.xlu1 %v105_v15  ;;  %v1103_v17 = vmul.f32 %v694_v11, %v95_v16 }
  0xd9   :  { %v106_v18 = vand.u32 2147483647, %v1103_v17 }
  0xdb   :  { %109 = vmax.xlane.f32.xlu1 %v106_v18 }
 0x160   :  { %v108_v52 = vpop.xlane.xlu1 %107 }
 0x161   :  { %v111_v53 = vmax.f32 %v108_v52, 1e-05 }
 0x163   :  { %895 = vrcp.f32 %v111_v53 }
 0x164   :  { %v110_v54 = vpop.xlane.xlu1 %109 }
 0x165   :  { %v112_v55 = vmax.f32 %v110_v54, 1e-05 }
 0x167   :  { %897 = vrcp.f32 %v112_v55 }
 0x170   :  { %v896_v56 = vpop.eup %895 }
 0x171   :  { %v114_v57 = vmul.f32 127.0, %v896_v56 }
 0x173   :  { %v117_v58 = vmul.f32 %v114_v57, %v1100_v13  ;;  %v122_v13 = vmul.f32 0.007874016, %v111_v53 }
 0x174   :  { %v898_v59 = vpop.eup %897 }
 0x175   :  { %v116_v60 = vmul.f32 127.0, %v898_v59  ;;  %v771_v61 = vcvt.f32.s32 %v117_v58  ;;  %v774_v2 = vand.u32 2147483648, %v117_v58  ;;  %v769_v4 = vand.u32 2147483647, %v117_v58 }
 0x177   :  { %v118_v62 = vmul.f32 %v116_v60, %v1103_v17  ;;  %v772_v63 = vcvt.s32.f32 %v771_v61  ;;  %vm770_vm0 = vcmp.lt.f32.partialorder %v769_v4, 8388608.0  ;;  %v123_v17 = vmul.f32 0.007874016, %v112_v55 }
 0x179   :  { %v773_v0 = vand.u32 2147483647, %v772_v63  ;;  %v779_v1 = vcvt.f32.s32 %v118_v62  ;;  %v777_v5 = vand.u32 2147483647, %v118_v62  ;;  %v782_v8 = vand.u32 2147483648, %v118_v62 }
 0x17b   :  { %v780_v3 = vcvt.s32.f32 %v779_v1  ;;  %v775_v6 = vor.u32 %v774_v2, %v773_v0  ;;  %vm778_vm1 = vcmp.lt.f32.partialorder %v777_v5, 8388608.0 }
 0x17d   :  { %v781_v7 = vand.u32 2147483647, %v780_v3  ;;  %v776_v10 = vsel %vm770_vm0, %v775_v6, %v117_v58  ;;  %v458_v3 = vld [vmem:[%s1121_s4] sm:$0x3]  ;;  %s1040_s4 = smov [#allocation10]  }
 0x17e   :  { %s680_s20 = sshll.u32 %s1040_s4, 4  ;;  %s681_s20 = int_to_ptr.vmem [resolvable:$true] %s680_s20 }
 0x17f   :  { %v783_v9 = vor.u32 %v782_v8, %v781_v7  ;;  %s1003_s21 = scalar_lea.vmem %s681_s20, 256  ;;  %p1008_p7 = scmp.lt.s32.totalorder %s681_s20, %s681_s20 }
 0x180   :  { %p1004_p6 = scmp.ne.s32.totalorder %s681_s20, %s1003_s21  ;;  %p1009_p8 = scmp.lt.s32.totalorder %s1003_s21, %s1003_s21 }
 0x181   :  { %v784_v11 = vsel %vm778_vm1, %v783_v9, %v118_v62  ;;  %v460_v62 = vlaneseq }
 0x182   :  { %v121_v12 = vpack.c.bf16 %v784_v11, %v776_v10  ;;  %p1010_p9 = por %p1009_p8, %p1008_p7 }
 0x183   :  { %v461_v0 = vshrl.u32 %v460_v62, 7 }
 0x184   :  { %253 = vmatmul.mubr.bf16.vlgmr.msra.gmra.mxu0 %v121_v12  ;;  %392 = vmatmul.mubr.bf16.vlgmr.msra.gmra.mxu1 %v121_v12  ;;  %p1011_p10 = pnand %p1010_p9, %p1004_p6 }
 0x185   :  { %v462_v1 = vsub.s32 0, %v461_v0  ;;  %v466_v2 = vsub.s32 1, %v461_v0 }
 0x187   :  { %v463_v4 = vrot.slane %v458_v3, %v462_v1  ;;  %v467_v5 = vrot.slane %v458_v3, %v466_v2 }
 0x244   :  { %v254_v14 = vpop.f32.mrf.mxu0  ;;  %v393_v35 = vpop.f32.mrf.mxu1 }
 0x245   :  { %v402_v15 = vmul.f32 %v254_v14, %v122_v13 }
 0x246   :  { %v256_v16 = vpop.f32.mrf.mxu0  ;;  %v395_v37 = vpop.f32.mrf.mxu1 }
 0x247   :  { %v727_v18 = vmul.f32 -1.442695, %v402_v15  ;;  %v403_v19 = vmul.f32 %v256_v16, %v122_v13 }
 0x248   :  { %v258_v20 = vpop.f32.mrf.mxu0  ;;  %v397_v43 = vpop.f32.mrf.mxu1 }
 0x249   :  { %899 = vpow2.f32 %v727_v18  ;;  %v728_v21 = vmul.f32 -1.442695, %v403_v19  ;;  %v404_v22 = vmul.f32 %v258_v20, %v123_v17 }
 0x24a   :  { %v260_v23 = vpop.f32.mrf.mxu0  ;;  %v399_v51 = vpop.f32.mrf.mxu1 }
 0x24b   :  { %901 = vpow2.f32 %v728_v21  ;;  %v729_v24 = vmul.f32 -1.442695, %v404_v22  ;;  %v405_v25 = vmul.f32 %v260_v23, %v123_v17  ;;  %v875_v22 = vld [vmem:[#allocation8 + $0x78] sm:$0xff]  }
 0x24c   :  { %747 = vmatprep.subr.bf16.mxu0 %v875_v22 }
 0x24d   :  { %903 = vpow2.f32 %v729_v24  ;;  %v730_v26 = vmul.f32 -1.442695, %v405_v25  ;;  %v877_v24 = vld [vmem:[#allocation8 + $0x70] sm:$0xff]  }
 0x24e   :  { %v878_v25 = vld [vmem:[#allocation8 + $0x30] sm:$0xff]  }
 0x24f   :  { %905 = vpow2.f32 %v730_v26  ;;  %v879_v26 = vld [vmem:[#allocation8 + $0x68] sm:$0xff]  }
 0x256   :  { %v900_v27 = vpop.eup %899 }
 0x257   :  { %v418_v28 = vadd.f32 1.0, %v900_v27  ;;  %v880_v27 = vld [vmem:[#allocation8 + $0x28] sm:$0xff]  }
 0x258   :  { %v902_v29 = vpop.eup %901 }
 0x259   :  { %907 = vrcp.f32 %v418_v28  ;;  %v419_v30 = vadd.f32 1.0, %v902_v29  ;;  %v881_v28 = vld [vmem:[#allocation8 + $0x60] sm:$0xff]  }
 0x25a   :  { %v904_v31 = vpop.eup %903  ;;  %v882_v29 = vld [vmem:[#allocation8 + $0x20] sm:$0xff]  }
 0x25b   :  { %909 = vrcp.f32 %v419_v30  ;;  %v420_v32 = vadd.f32 1.0, %v904_v31  ;;  %v883_v30 = vld [vmem:[#allocation8 + $0x58] sm:$0xff]  }
 0x25c   :  { %v906_v33 = vpop.eup %905  ;;  %v884_v31 = vld [vmem:[#allocation8 + $0x18] sm:$0xff]  }
 0x25d   :  { %911 = vrcp.f32 %v420_v32  ;;  %v421_v34 = vadd.f32 1.0, %v906_v33  ;;  %v885_v32 = vld [vmem:[#allocation8 + $0x50] sm:$0xff]  }
 0x25e   :  { %v886_v33 = vld [vmem:[#allocation8 + $0x10] sm:$0xff]  }
 0x25f   :  { %913 = vrcp.f32 %v421_v34  ;;  %v887_v34 = vld [vmem:[#allocation8 + $0x48] sm:$0xff]  }
 0x266   :  { %v908_v36 = vpop.eup %907 }
 0x267   :  { %v430_v38 = vmul.f32 %v908_v36, %v254_v14  ;;  %v889_v36 = vld [vmem:[#allocation8 + $0x40] sm:$0xff]  }
 0x268   :  { %v910_v39 = vpop.eup %909 }
 0x269   :  { %v434_v40 = vmul.f32 %v430_v38, %v393_v35  ;;  %v431_v41 = vmul.f32 %v910_v39, %v256_v16  ;;  %v888_v35 = vld [vmem:[#allocation8 + $0x8] sm:$0xff]  }
 0x26a   :  { %v912_v42 = vpop.eup %911 }
 0x26b   :  { %v435_v44 = vmul.f32 %v431_v41, %v395_v37  ;;  %v432_v45 = vmul.f32 %v912_v42, %v258_v20  ;;  %v438_v47 = vmul.f32 %v434_v40, %v434_v40  ;;  %v890_v37 = vld [vmem:[#allocation8] sm:$0xff]  }
 0x26c   :  { %v914_v46 = vpop.eup %913 }
 0x26d   :  { %v439_v48 = vmul.f32 %v435_v44, %v435_v44  ;;  %v436_v49 = vmul.f32 %v432_v45, %v397_v43  ;;  %v433_v50 = vmul.f32 %v914_v46, %v260_v23  ;;  %v876_v23 = vld [vmem:[#allocation8 + $0x38] sm:$0xff]  }
 0x26e   :  { %748 = vmatpush3.bf16.msra.mxu0 %v876_v23 }
 0x26f   :  { %v437_v52 = vmul.f32 %v433_v50, %v399_v51  ;;  %v442_v53 = vadd.f32 %v439_v48, %v438_v47  ;;  %v440_v54 = vmul.f32 %v436_v49, %v436_v49  ;;  %749 = vmatprep.subr.bf16.mxu0 %v877_v24 }
 0x271   :  { %v441_v55 = vmul.f32 %v437_v52, %v437_v52  ;;  %443 = vadd.xlane.f32.xlu0 %v442_v53 }
 0x272   :  { %750 = vmatpush3.bf16.msra.mxu0 %v878_v25 }
 0x273   :  { %v445_v56 = vadd.f32 %v441_v55, %v440_v54  ;;  %751 = vmatprep.subr.bf16.mxu0 %v879_v26 }
 0x275   :  { %446 = vadd.xlane.f32.xlu1 %v445_v56 }
 0x276   :  { %752 = vmatpush3.bf16.msra.mxu0 %v880_v27 }
 0x277   :  { %753 = vmatprep.subr.bf16.mxu0 %v881_v28 }
 0x27a   :  { %754 = vmatpush3.bf16.msra.mxu0 %v882_v29 }
 0x27b   :  { %755 = vmatprep.subr.bf16.mxu0 %v883_v30 }
 0x27e   :  { %756 = vmatpush3.bf16.msra.mxu0 %v884_v31 }
 0x27f   :  { %757 = vmatprep.subr.bf16.mxu0 %v885_v32 }
 0x282   :  { %758 = vmatpush3.bf16.msra.mxu0 %v886_v33 }
 0x283   :  { %759 = vmatprep.subr.bf16.mxu0 %v887_v34 }
 0x286   :  { %760 = vmatpush3.bf16.msra.mxu0 %v888_v35 }
 0x287   :  { %761 = vmatprep.subr.bf16.mxu0 %v889_v36 }
 0x28a   :  { %762 = vmatpush3.bf16.msra.mxu0 %v890_v37 }
 0x2fa   :  { %v444_v57 = vpop.xlane.xlu0 %443 }
 0x2fb   :  { %v448_v58 = vmul.f32 0.00390625, %v444_v57 }
 0x2fd   :  { %v450_v59 = vadd.f32 1e-08, %v448_v58 }
 0x2fe   :  { %v447_v60 = vpop.xlane.xlu1 %446 }
 0x2ff   :  { %915 = vrsqrt.f32 %v450_v59  ;;  %v449_v61 = vmul.f32 0.00390625, %v447_v60 }
 0x301   :  { %v451_v63 = vadd.f32 1e-08, %v449_v61 }
 0x303   :  { %917 = vrsqrt.f32 %v451_v63 }
 0x30c   :  { %v916_v6 = vpop.eup %915 }
 0x30d   :  { %v454_v7 = vmul.f32 %v916_v6, %v434_v40  ;;  %v455_v8 = vmul.f32 %v916_v6, %v435_v44 }
 0x30f   :  { %v470_v9 = vmul.f32 %v463_v4, %v454_v7  ;;  %v471_v10 = vmul.f32 %v467_v5, %v455_v8 }
 0x310   :  { %v918_v11 = vpop.eup %917 }
 0x311   :  { %v474_v12 = vand.u32 2147483647, %v470_v9  ;;  %v475_v13 = vand.u32 2147483647, %v471_v10  ;;  %v456_v14 = vmul.f32 %v918_v11, %v436_v49  ;;  %v457_v15 = vmul.f32 %v918_v11, %v437_v52 }
 0x313   :  { %v478_v16 = vmax.f32.f32 %v474_v12, %v475_v13  ;;  %v472_v17 = vmul.f32 %v463_v4, %v456_v14  ;;  %v473_v18 = vmul.f32 %v467_v5, %v457_v15 }
 0x315   :  { %479 = vmax.xlane.f32.xlu0 %v478_v16  ;;  %v476_v19 = vand.u32 2147483647, %v472_v17  ;;  %v477_v20 = vand.u32 2147483647, %v473_v18 }
 0x317   :  { %v481_v21 = vmax.f32.f32 %v476_v19, %v477_v20 }
 0x319   :  { %482 = vmax.xlane.f32.xlu1 %v481_v21 }
 0x39e   :  { %v480_v38 = vpop.xlane.xlu0 %479 }
 0x39f   :  { %v484_v39 = vmax.f32 %v480_v38, 1e-05 }
 0x3a1   :  { %919 = vrcp.f32 %v484_v39 }
 0x3a2   :  { %v483_v40 = vpop.xlane.xlu1 %482 }
 0x3a3   :  { %v485_v41 = vmax.f32 %v483_v40, 1e-05 }
 0x3a5   :  { %921 = vrcp.f32 %v485_v41  ;;  %v501_v23 = vmul.f32 0.007874016, %v485_v41 }
 0x3ae   :  { %v920_v42 = vpop.eup %919 }
 0x3af   :  { %v487_v43 = vmul.f32 127.0, %v920_v42 }
 0x3b1   :  { %v490_v44 = vmul.f32 %v487_v43, %v470_v9  ;;  %v491_v45 = vmul.f32 %v487_v43, %v471_v10 }
 0x3b2   :  { %v922_v46 = vpop.eup %921 }
 0x3b3   :  { %v787_v47 = vcvt.f32.s32 %v490_v44  ;;  %v489_v48 = vmul.f32 127.0, %v922_v46  ;;  %v795_v49 = vcvt.f32.s32 %v491_v45  ;;  %v793_v57 = vand.u32 2147483647, %v491_v45 }
 0x3b4   :  { %v798_v58 = vand.u32 2147483648, %v491_v45  ;;  %v785_v61 = vand.u32 2147483647, %v490_v44  ;;  %v790_v62 = vand.u32 2147483648, %v490_v44 }
 0x3b5   :  { %v492_v50 = vmul.f32 %v489_v48, %v472_v17  ;;  %v493_v51 = vmul.f32 %v489_v48, %v473_v18  ;;  %v796_v52 = vcvt.s32.f32 %v795_v49  ;;  %v788_v53 = vcvt.s32.f32 %v787_v47 }
 0x3b6   :  { %vm794_vm2 = vcmp.lt.f32.partialorder %v793_v57, 8388608.0  ;;  %vm786_vm4 = vcmp.lt.f32.partialorder %v785_v61, 8388608.0  ;;  %v500_v18 = vmul.f32 0.007874016, %v484_v39 }
 0x3b7   :  { %v803_v54 = vcvt.f32.s32 %v492_v50  ;;  %v797_v55 = vand.u32 2147483647, %v796_v52  ;;  %v811_v56 = vcvt.f32.s32 %v493_v51  ;;  %v789_v59 = vand.u32 2147483647, %v788_v53 }
 0x3b8   :  { %v809_v0 = vand.u32 2147483647, %v493_v51  ;;  %v814_v1 = vand.u32 2147483648, %v493_v51  ;;  %v801_v2 = vand.u32 2147483647, %v492_v50  ;;  %v806_v3 = vand.u32 2147483648, %v492_v50 }
 0x3b9   :  { %v812_v60 = vcvt.s32.f32 %v811_v56  ;;  %v804_v63 = vcvt.s32.f32 %v803_v54  ;;  %v799_v4 = vor.u32 %v798_v58, %v797_v55  ;;  %v791_v6 = vor.u32 %v790_v62, %v789_v59 }
 0x3ba   :  { %vm810_vm3 = vcmp.lt.f32.partialorder %v809_v0, 8388608.0  ;;  %vm802_vm5 = vcmp.lt.f32.partialorder %v801_v2, 8388608.0 }
 0x3bb   :  { %v813_v5 = vand.u32 2147483647, %v812_v60  ;;  %v805_v7 = vand.u32 2147483647, %v804_v63  ;;  %v800_v10 = vsel %vm794_vm2, %v799_v4, %v491_v45  ;;  %v792_v12 = vsel %vm786_vm4, %v791_v6, %v490_v44 }
 0x3bd   :  { %v815_v8 = vor.u32 %v814_v1, %v813_v5  ;;  %v807_v9 = vor.u32 %v806_v3, %v805_v7 }
 0x3bf   :  { %v816_v11 = vsel %vm810_vm3, %v815_v8, %v493_v51  ;;  %v808_v13 = vsel %vm802_vm5, %v807_v9, %v492_v50 }
 0x3c0   :  { %v499_v14 = vpack.c.bf16 %v816_v11, %v800_v10  ;;  %v498_v15 = vpack.c.bf16 %v808_v13, %v792_v12 }
 0x3c2   :  { %662 = vmatprep.mubr.bf16.mxu0 %v499_v14 }
 0x3c3   :  { %663 = vmatmul.mubr.bf16.vlgmr.msra.gmra.mxu0 %v498_v15 }
 0x483   :  { %v763_v16 = vpop.f32.mrf.mxu0 }
 0x485   :  { %v764_v17 = vpop.f32.mrf.mxu0 }
 0x486   :  { %v765_v19 = vadd.f32 %v764_v17, %v763_v16 }
 0x487   :  { %v766_v20 = vpop.f32.mrf.mxu0 }
 0x488   :  { %v671_v21 = vmul.f32 %v765_v19, %v500_v18 }
 0x489   :  { %v767_v22 = vpop.f32.mrf.mxu0 }
 0x48a   :  { %673 = vst [vmem:[#allocation10] sm:$0xff] %v671_v21  ;;  %v768_v24 = vadd.f32 %v767_v22, %v766_v20 }
 0x48c   :  { %v672_v25 = vmul.f32 %v768_v24, %v501_v23 }
 0x48e   :  { %674 = vst [vmem:[#allocation10 + $0x8] sm:$0xff] %v672_v25 }
 0x48f   :  { %1014 = shalt.err (!%p1011_p10)
}
 0x490   :  { %686 = dma.vmem_to_hbm [thread:$0]  %s681_s20, 256, %s1123_s6, [#allocation4], %s1033_s26, %s1033_s26, %s1034_s27  }
 0x491   :  { %1029 = dma.done.wait [#allocation4], 256  }
 0x492   :  { %1030 = vsyncadd [#allocation4], 4294967040 }
 0x493   :  { %690 = vsyncpa [#allocation3], 1 }
 0x494   :  { %691 = vsyncpa [#allocation6], 1 }
 0x495   :  { %692 = vsyncpa [#allocation9], 1 }
 0x496   :  { %693 = vsyncpa [#allocation4], 1 }

</bundles_post_ra>
